<compile_context>
chip_gen: v5e
topology: v5e:2x2
jax: 0.10.0
libtpu: 0.0.40
codegen_flags: <defaults>
</compile_context>

<pallas_src>
import jax
import jax.numpy as jnp
from jax.experimental import pallas as pl
from jax.experimental.pallas import tpu as pltpu

_LANE = 128
_SUBLANE = 8


def _round_up(x, m):
    return (x + m - 1) // m * m


def _vmem_limit_bytes():
    """Per-generation VMEM budget (v5e/v6e: ~96 MiB, v7x: ~48 MiB)."""
    try:
        cap = int(pltpu.get_tpu_info().vmem_capacity_bytes)
    except Exception:  # be conservative if the query is unavailable
        cap = 64 * 1024 * 1024
    return min(cap * 3 // 4, 96 * 1024 * 1024)


def _fold_affine(s, ss, count, w, b, eps):
    """Fold batch stats + affine into per-channel scale/shift (f32, O(C) work)."""
    mean = s / count
    # single-pass variance; clamp to avoid NaNs from catastrophic cancellation
    var = jnp.maximum(ss / count - mean * mean, 0.0)
    scale = w.astype(jnp.float32) * jax.lax.rsqrt(var + eps)
    shift = b.astype(jnp.float32) - mean * scale
    return scale, shift


# ---------------------------------------------------------------------------
# Channels-last path: x is (M, C) with channels on the lane axis.
# ---------------------------------------------------------------------------

def _tile_sizes_2d(M, C, itemsize, blk_budget):
    c_blocks = pl.cdiv(C, _LANE)
    # Keep >= 2 channel-grid steps when C allows so a 2-TC chip (v7x) can split
    # the parallel axis.
    max_cb = c_blocks if c_blocks < 2 else max(1, c_blocks // 2)
    bc_blocks = min(max_cb, max(1, blk_budget // (_SUBLANE * _LANE * itemsize)))
    bc = bc_blocks * _LANE
    m_round = _round_up(M, _SUBLANE)
    tm = blk_budget // (bc * itemsize)
    tm = max(_SUBLANE, min(m_round, tm // _SUBLANE * _SUBLANE))
    return tm, bc


def _make_stats_kernel_2d(M, tm, need_mask):
    def kernel(xr_ref, xi_ref, stats_ref):
        m = pl.program_id(1)

        @pl.when(m == 0)
        def _init():
            stats_ref[...] = jnp.zeros_like(stats_ref)

        xr = xr_ref[...]
        xi = xi_ref[...]
        if need_mask:  # last row block may contain garbage rows beyond M
            row = jax.lax.broadcasted_iota(jnp.int32, xr.shape, 0) + m * tm
            valid = row < M
            xr = jnp.where(valid, xr, jnp.zeros_like(xr))
            xi = jnp.where(valid, xi, jnp.zeros_like(xi))
        xr = xr.astype(jnp.float32)   # no-op for f32 inputs
        xi = xi.astype(jnp.float32)
        sr = jnp.sum(xr, axis=0, keepdims=True)          # (1, bc)
        sr2 = jnp.sum(xr * xr, axis=0, keepdims=True)
        si = jnp.sum(xi, axis=0, keepdims=True)
        si2 = jnp.sum(xi * xi, axis=0, keepdims=True)
        stats_ref[...] += jnp.concatenate([sr, sr2, si, si2], axis=0)  # (4, bc)

    return kernel


def _norm_kernel_2d(xr_ref, xi_ref, p_ref, or_ref, oi_ref):
    p = p_ref[...]                                        # (4, bc) f32
    xr = xr_ref[...].astype(jnp.float32)
    xi = xi_ref[...].astype(jnp.float32)
    or_ref[...] = (xr * p[0:1, :] + p[1:2, :]).astype(or_ref.dtype)
    oi_ref[...] = (xi * p[2:3, :] + p[3:4, :]).astype(oi_ref.dtype)


def _bn_channels_last(xr2, xi2, w_r, b_r, w_i, b_i, eps):
    M, C = xr2.shape
    itemsize = jnp.dtype(xr2.dtype).itemsize
    vmem_limit = _vmem_limit_bytes()
    blk_budget = max(64 * 1024, vmem_limit // 12)
    tm, bc = _tile_sizes_2d(M, C, itemsize, blk_budget)
    nc = pl.cdiv(C, bc)
    nm = pl.cdiv(M, tm)

    # ---- pass 1: per-channel sum / sum-of-squares (output resident over M) ----
    stats = pl.pallas_call(
        _make_stats_kernel_2d(M, tm, (M % tm) != 0),
        out_shape=jax.ShapeDtypeStruct((4, C), jnp.float32),
        grid_spec=pltpu.PrefetchScalarGridSpec(
            num_scalar_prefetch=0,
            grid=(nc, nm),
            in_specs=[
                pl.BlockSpec((tm, bc), lambda c, m: (m, c)),
                pl.BlockSpec((tm, bc), lambda c, m: (m, c)),
            ],
            out_specs=pl.BlockSpec((4, bc), lambda c, m: (0, c)),
        ),
        compiler_params=pltpu.CompilerParams(
            dimension_semantics=("parallel", "arbitrary"),
            vmem_limit_bytes=vmem_limit,
        ),
    )(xr2, xi2)

    # ---- tiny O(C) finalize in XLA ----
    cnt = float(M)
    scale_r, shift_r = _fold_affine(stats[0], stats[1], cnt, w_r, b_r, eps)
    scale_i, shift_i = _fold_affine(stats[2], stats[3], cnt, w_i, b_i, eps)
    params = jnp.stack([scale_r, shift_r, scale_i, shift_i], axis=0)   # (4, C)

    # ---- pass 2: out = x * scale + shift ----
    out_r, out_i = pl.pallas_call(
        _norm_kernel_2d,
        out_shape=(jax.ShapeDtypeStruct((M, C), xr2.dtype),
                   jax.ShapeDtypeStruct((M, C), xi2.dtype)),
        grid_spec=pltpu.PrefetchScalarGridSpec(
            num_scalar_prefetch=0,
            grid=(nc, nm),
            in_specs=[
                pl.BlockSpec((tm, bc), lambda c, m: (m, c)),
                pl.BlockSpec((tm, bc), lambda c, m: (m, c)),
                pl.BlockSpec((4, bc), lambda c, m: (0, c)),
            ],
            out_specs=[
                pl.BlockSpec((tm, bc), lambda c, m: (m, c)),
                pl.BlockSpec((tm, bc), lambda c, m: (m, c)),
            ],
        ),
        compiler_params=pltpu.CompilerParams(
            dimension_semantics=("parallel", "parallel"),
            vmem_limit_bytes=vmem_limit,
        ),
    )(xr2, xi2, params)
    return out_r, out_i


# ---------------------------------------------------------------------------
# Native 3D path: x is (N, C, L), channels on sublanes, L on lanes (L >= 128).
# ---------------------------------------------------------------------------

def _tile_sizes_3d(N, C, L, itemsize, blk_budget):
    bc = min(_round_up(C, _SUBLANE), 512)                 # channels on sublanes
    if bc * L * itemsize <= blk_budget:
        tl = L                                            # full length per block
    else:
        tl = max(_LANE, (blk_budget // (bc * itemsize)) // _LANE * _LANE)
        tl = min(tl, (L // _LANE) * _LANE)
    tn = max(1, min(N, blk_budget // (bc * tl * itemsize)))
    return tn, bc, tl


def _make_stats_kernel_3d(N, L, tn, tl, mask_n, mask_l):
    def kernel(xr_ref, xi_ref, stats_ref):
        n = pl.program_id(1)
        l = pl.program_id(2)

        @pl.when((n == 0) & (l == 0))
        def _init():
            stats_ref[...] = jnp.zeros_like(stats_ref)

        xr = xr_ref[...]
        xi = xi_ref[...]
        if mask_n or mask_l:
            valid = None
            if mask_n:
                rn = jax.lax.broadcasted_iota(jnp.int32, xr.shape, 0) + n * tn
                valid = rn < N
            if mask_l:
                rl = jax.lax.broadcasted_iota(jnp.int32, xr.shape, 2) + l * tl
                vl = rl < L
                valid = vl if valid is None else jnp.logical_and(valid, vl)
            xr = jnp.where(valid, xr, jnp.zeros_like(xr))
            xi = jnp.where(valid, xi, jnp.zeros_like(xi))
        xr = xr.astype(jnp.float32)
        xi = xi.astype(jnp.float32)
        # reduce leading (N) axis, then the lane (L) axis (XLU) -> (bc, 1)
        sr = jnp.sum(jnp.sum(xr, axis=0), axis=1, keepdims=True)
        sr2 = jnp.sum(jnp.sum(xr * xr, axis=0), axis=1, keepdims=True)
        si = jnp.sum(jnp.sum(xi, axis=0), axis=1, keepdims=True)
        si2 = jnp.sum(jnp.sum(xi * xi, axis=0), axis=1, keepdims=True)
        stats_ref[...] += jnp.concatenate([sr, sr2, si, si2], axis=1)  # (bc, 4)

    return kernel


def _norm_kernel_3d(xr_ref, xi_ref, p_ref, or_ref, oi_ref):
    p = p_ref[...]                                        # (bc, 4) f32
    xr = xr_ref[...].astype(jnp.float32)
    xi = xi_ref[...].astype(jnp.float32)
    or_ref[...] = (xr * p[:, 0:1] + p[:, 1:2]).astype(or_ref.dtype)
    oi_ref[...] = (xi * p[:, 2:3] + p[:, 3:4]).astype(oi_ref.dtype)


def _bn_native_3d(x_r, x_i, w_r, b_r, w_i, b_i, eps):
    N, C, L = x_r.shape
    itemsize = jnp.dtype(x_r.dtype).itemsize
    vmem_limit = _vmem_limit_bytes()
    blk_budget = max(64 * 1024, vmem_limit // 12)
    tn, bc, tl = _tile_sizes_3d(N, C, L, itemsize, blk_budget)
    nc = pl.cdiv(C, bc)
    nn = pl.cdiv(N, tn)
    nl = pl.cdiv(L, tl)

    stats = pl.pallas_call(
        _make_stats_kernel_3d(N, L, tn, tl, (N % tn) != 0, (L % tl) != 0),
        out_shape=jax.ShapeDtypeStruct((C, 4), jnp.float32),
        grid_spec=pltpu.PrefetchScalarGridSpec(
            num_scalar_prefetch=0,
            grid=(nc, nn, nl),
            in_specs=[
                pl.BlockSpec((tn, bc, tl), lambda c, n, l: (n, c, l)),
                pl.BlockSpec((tn, bc, tl), lambda c, n, l: (n, c, l)),
            ],
            out_specs=pl.BlockSpec((bc, 4), lambda c, n, l: (c, 0)),
        ),
        compiler_params=pltpu.CompilerParams(
            dimension_semantics=("parallel", "arbitrary", "arbitrary"),
            vmem_limit_bytes=vmem_limit,
        ),
    )(x_r, x_i)

    cnt = float(N * L)
    scale_r, shift_r = _fold_affine(stats[:, 0], stats[:, 1], cnt, w_r, b_r, eps)
    scale_i, shift_i = _fold_affine(stats[:, 2], stats[:, 3], cnt, w_i, b_i, eps)
    params = jnp.stack([scale_r, shift_r, scale_i, shift_i], axis=1)   # (C, 4)

    out_r, out_i = pl.pallas_call(
        _norm_kernel_3d,
        out_shape=(jax.ShapeDtypeStruct((N, C, L), x_r.dtype),
                   jax.ShapeDtypeStruct((N, C, L), x_i.dtype)),
        grid_spec=pltpu.PrefetchScalarGridSpec(
            num_scalar_prefetch=0,
            grid=(nc, nn, nl),
            in_specs=[
                pl.BlockSpec((tn, bc, tl), lambda c, n, l: (n, c, l)),
                pl.BlockSpec((tn, bc, tl), lambda c, n, l: (n, c, l)),
                pl.BlockSpec((bc, 4), lambda c, n, l: (c, 0)),
            ],
            out_specs=[
                pl.BlockSpec((tn, bc, tl), lambda c, n, l: (n, c, l)),
                pl.BlockSpec((tn, bc, tl), lambda c, n, l: (n, c, l)),
            ],
        ),
        compiler_params=pltpu.CompilerParams(
            dimension_semantics=("parallel", "parallel", "parallel"),
            vmem_limit_bytes=vmem_limit,
        ),
    )(x_r, x_i, params)
    return out_r, out_i


# ---------------------------------------------------------------------------
# Public wrapper + module mirror
# ---------------------------------------------------------------------------

def naive_complex_batch_norm1d(x_r, x_i, weight_r, bias_r, weight_i, bias_i,
                               eps=1e-5):
    """BatchNorm1d applied independently to real & imaginary parts (batch stats)."""
    assert x_r.shape == x_i.shape
    if x_r.ndim == 2:
        return _bn_channels_last(x_r, x_i, weight_r, bias_r, weight_i, bias_i, eps)
    if x_r.ndim == 3:
        N, C, L = x_r.shape
        if L >= _LANE:
            # Native layout: channels on sublanes, L on lanes; no wrapper
            # transposes at all.
            return _bn_native_3d(x_r, x_i, weight_r, bias_r, weight_i, bias_i, eps)
        # Small L: the lane axis would be underfilled (masked stores, lane-padded
        # VMEM), so use a channels-last (N*L, C) view.  This costs one transpose
        # pass per tensor each way in XLA.
        M = N * L
        xr2 = jnp.transpose(x_r, (0, 2, 1)).reshape(M, C)
        xi2 = jnp.transpose(x_i, (0, 2, 1)).reshape(M, C)
        o_r, o_i = _bn_channels_last(xr2, xi2, weight_r, bias_r, weight_i,
                                     bias_i, eps)
        o_r = o_r.reshape(N, L, C).transpose(0, 2, 1)
        o_i = o_i.reshape(N, L, C).transpose(0, 2, 1)
        return o_r, o_i
    raise ValueError("BatchNorm1d expects 2D (N, C) or 3D (N, C, L) input")


class NaiveComplexBatchNorm1d:
    """Mirror of the PyTorch module: independent BatchNorm1d on real & imag parts."""

    def __init__(self, num_features, eps=1e-05, momentum=0.1, affine=True,
                 track_running_stats=True):
        self.num_features = num_features
        self.eps = eps
        self.momentum = momentum
        self.affine = affine
        self.track_running_stats = track_running_stats
        if affine:
            self.weight_r = jnp.ones((num_features,), jnp.float32)
            self.bias_r = jnp.zeros((num_features,), jnp.float32)
            self.weight_i = jnp.ones((num_features,), jnp.float32)
            self.bias_i = jnp.zeros((num_features,), jnp.float32)
        # TODO(synk): running_mean / running_var buffers (momentum update, eval
        # mode) are training-state side effects and are not implemented here.

    def __call__(self, input_r, input_i):
        C = self.num_features
        if self.affine:
            w_r, b_r = self.weight_r, self.bias_r
            w_i, b_i = self.weight_i, self.bias_i
        else:
            w_r = w_i = jnp.ones((C,), jnp.float32)
            b_r = b_i = jnp.zeros((C,), jnp.float32)
        return naive_complex_batch_norm1d(input_r, input_i, w_r, b_r, w_i, b_i,
                                          eps=self.eps)


def _ref_bn1d(x, w, b, eps):
    """Pure-JAX reference: training-mode BatchNorm1d (biased batch stats + affine)."""
    if x.ndim == 2:
        axes, pshape = (0,), (1, -1)
    else:
        axes, pshape = (0, 2), (1, -1, 1)
    mean = jnp.mean(x, axis=axes, keepdims=True)
    var = jnp.mean((x - mean) ** 2, axis=axes, keepdims=True)
    return (x - mean) / jnp.sqrt(var + eps) * w.reshape(pshape) + b.reshape(pshape)


if __name__ == "__main__":
    key = jax.random.PRNGKey(0)
    keys = jax.random.split(key, 12)

    # --- case 1: 3D (N, C, L) with small L -> channels-last fallback path ---
    N, C, L = 2, 32, 8
    x_r = jax.random.normal(keys[0], (N, C, L), dtype=jnp.float32)
    x_i = jax.random.normal(keys[1], (N, C, L), dtype=jnp.float32)

    bn = NaiveComplexBatchNorm1d(C)
    bn.weight_r = 1.0 + 0.5 * jax.random.normal(keys[2], (C,), dtype=jnp.float32)
    bn.bias_r = 0.1 * jax.random.normal(keys[3], (C,), dtype=jnp.float32)
    bn.weight_i = 1.0 + 0.5 * jax.random.normal(keys[4], (C,), dtype=jnp.float32)
    bn.bias_i = 0.1 * jax.random.normal(keys[5], (C,), dtype=jnp.float32)

    out_r, out_i = bn(x_r, x_i)
    jax.block_until_ready((out_r, out_i))
    assert out_r.shape == x_r.shape and out_i.shape == x_i.shape
    assert jnp.allclose(out_r, _ref_bn1d(x_r, bn.weight_r, bn.bias_r, bn.eps),
                        atol=1e-4, rtol=1e-4)
    assert jnp.allclose(out_i, _ref_bn1d(x_i, bn.weight_i, bn.bias_i, bn.eps),
                        atol=1e-4, rtol=1e-4)

    # --- case 2: 2D (N, C) with N not a multiple of 8 (exercises the row mask) ---
    x2_r = jax.random.normal(keys[6], (6, C), dtype=jnp.float32)
    x2_i = jax.random.normal(keys[7], (6, C), dtype=jnp.float32)
    o2_r, o2_i = bn(x2_r, x2_i)
    jax.block_until_ready((o2_r, o2_i))
    assert jnp.allclose(o2_r, _ref_bn1d(x2_r, bn.weight_r, bn.bias_r, bn.eps),
                        atol=1e-4, rtol=1e-4)
    assert jnp.allclose(o2_i, _ref_bn1d(x2_i, bn.weight_i, bn.bias_i, bn.eps),
                        atol=1e-4, rtol=1e-4)

    # --- case 3: 3D (N, C, L) with L >= 128 -> native-layout path ---
    C3, L3 = 16, 128
    bn3 = NaiveComplexBatchNorm1d(C3)
    bn3.weight_r = 1.0 + 0.5 * jax.random.normal(keys[8], (C3,), dtype=jnp.float32)
    bn3.bias_r = 0.1 * jax.random.normal(keys[9], (C3,), dtype=jnp.float32)
    bn3.weight_i = 1.0 + 0.5 * jax.random.normal(keys[10], (C3,), dtype=jnp.float32)
    bn3.bias_i = 0.1 * jax.random.normal(keys[11], (C3,), dtype=jnp.float32)
    x3_r = jax.random.normal(keys[6], (2, C3, L3), dtype=jnp.float32)
    x3_i = jax.random.normal(keys[7], (2, C3, L3), dtype=jnp.float32)
    o3_r, o3_i = bn3(x3_r, x3_i)
    jax.block_until_ready((o3_r, o3_i))
    assert jnp.allclose(o3_r, _ref_bn1d(x3_r, bn3.weight_r, bn3.bias_r, bn3.eps),
                        atol=1e-4, rtol=1e-4)
    assert jnp.allclose(o3_i, _ref_bn1d(x3_i, bn3.weight_i, bn3.bias_i, bn3.eps),
                        atol=1e-4, rtol=1e-4)

    print("KERNEL_OK")
</pallas_src>

<mosaic_0001>
module attributes {stable_mosaic.version = 11 : i64} {
  func.func @kernel(%arg0: i32, %arg1: i32, %arg2: memref<16x128xf32, #tpu.memory_space<vmem>>, %arg3: memref<16x128xf32, #tpu.memory_space<vmem>>, %arg4: memref<4x128xf32, #tpu.memory_space<vmem>>) attributes {dimension_semantics = [#tpu.dimension_semantics<parallel>, #tpu.dimension_semantics<arbitrary>], iteration_bounds = array<i64: 1, 1>, scalar_prefetch = 0 : i64, scratch_operands = 0 : i64, tpu.core_type = #tpu.core_type<tc>, window_params = [{transform_indices = @transform_0, window_bounds = array<i64: 16, 128>}, {transform_indices = @transform_1, window_bounds = array<i64: 16, 128>}, {transform_indices = @transform_2, window_bounds = array<i64: 4, 128>}]} {
    %c0_i32 = arith.constant 0 : i32
    %0 = arith.cmpi eq, %arg1, %c0_i32 : i32
    %1 = arith.extui %0 : i1 to i32
    %c0_i32_0 = arith.constant 0 : i32
    %2 = arith.cmpi ne, %1, %c0_i32_0 : i32
    scf.if %2 {
      %cst_11 = arith.constant 0.000000e+00 : f32
      %19 = vector.broadcast %cst_11 : f32 to vector<4x128xf32>
      %c0_12 = arith.constant 0 : index
      %c0_13 = arith.constant 0 : index
      %20 = vector.load %arg4[%c0_12, %c0_13] : memref<4x128xf32, #tpu.memory_space<vmem>>, vector<4x128xf32>
      tpu.vector_store %arg4[%c0_12, %c0_13], %19 {strides = array<i32>} : memref<4x128xf32, #tpu.memory_space<vmem>>, vector<4x128xf32>,
    } else {
    }
    %c0 = arith.constant 0 : index
    %c0_1 = arith.constant 0 : index
    %3 = vector.load %arg2[%c0, %c0_1] : memref<16x128xf32, #tpu.memory_space<vmem>>, vector<16x128xf32>
    %c0_2 = arith.constant 0 : index
    %c0_3 = arith.constant 0 : index
    %4 = vector.load %arg3[%c0_2, %c0_3] : memref<16x128xf32, #tpu.memory_space<vmem>>, vector<16x128xf32>
    %cst = arith.constant dense<0.000000e+00> : vector<128xf32>
    %5 = vector.multi_reduction <add>, %3, %cst [0] : vector<16x128xf32> to vector<128xf32>
    %6 = vector.shape_cast %5 : vector<128xf32> to vector<1x128xf32>
    %7 = arith.mulf %3, %3 : vector<16x128xf32>
    %cst_4 = arith.constant dense<0.000000e+00> : vector<128xf32>
    %8 = vector.multi_reduction <add>, %7, %cst_4 [0] : vector<16x128xf32> to vector<128xf32>
    %9 = vector.shape_cast %8 : vector<128xf32> to vector<1x128xf32>
    %cst_5 = arith.constant dense<0.000000e+00> : vector<128xf32>
    %10 = vector.multi_reduction <add>, %4, %cst_5 [0] : vector<16x128xf32> to vector<128xf32>
    %11 = vector.shape_cast %10 : vector<128xf32> to vector<1x128xf32>
    %12 = arith.mulf %4, %4 : vector<16x128xf32>
    %cst_6 = arith.constant dense<0.000000e+00> : vector<128xf32>
    %13 = vector.multi_reduction <add>, %12, %cst_6 [0] : vector<16x128xf32> to vector<128xf32>
    %14 = vector.shape_cast %13 : vector<128xf32> to vector<1x128xf32>
    %c0_7 = arith.constant 0 : index
    %c0_8 = arith.constant 0 : index
    %15 = vector.load %arg4[%c0_7, %c0_8] : memref<4x128xf32, #tpu.memory_space<vmem>>, vector<4x128xf32>
    %16 = tpu.concatenate %6, %9, %11, %14 in 0 : vector<1x128xf32>, vector<1x128xf32>, vector<1x128xf32>, vector<1x128xf32> -> vector<4x128xf32>
    %17 = arith.addf %15, %16 : vector<4x128xf32>
    %c0_9 = arith.constant 0 : index
    %c0_10 = arith.constant 0 : index
    %18 = vector.load %arg4[%c0_9, %c0_10] : memref<4x128xf32, #tpu.memory_space<vmem>>, vector<4x128xf32>
    tpu.vector_store %arg4[%c0_9, %c0_10], %17 {strides = array<i32>} : memref<4x128xf32, #tpu.memory_space<vmem>>, vector<4x128xf32>,
    return
  }
  func.func @transform_0(%arg0: i32, %arg1: i32) -> (i32, i32) {
    %c0_i32 = arith.constant 0 : i32
    return %arg1, %arg0 : i32, i32
  }
  func.func @transform_1(%arg0: i32, %arg1: i32) -> (i32, i32) {
    %c0_i32 = arith.constant 0 : i32
    return %arg1, %arg0 : i32, i32
  }
  func.func @transform_2(%arg0: i32, %arg1: i32) -> (i32, i32) {
    %c0_i32 = arith.constant 0 : i32
    %c0_i32_0 = arith.constant 0 : i32
    return %c0_i32, %arg0 : i32, i32
  }
}

</mosaic_0001>

<bundles_post_ra>
// kernel: tpu_custom_call.1
= control target key start
LH: loop header
LB: loop body
LE: loop exit
PB: predicated region body
PF: predicated region fallthrough
CT: control target
= control target key end

     0   :  { %7 = vsyncpa [#allocation3], 0  ;;  %s226_s0 = inlined_call_operand.hbm [shape: f32[16,32], index: 0, kind: input, shape index: {}]   ;;  %s227_s1 = inlined_call_operand.hbm [shape: f32[16,32], index: 1, kind: input, shape index: {}]   ;;  %s228_s2 = inlined_call_operand.hbm [shape: f32[4,32], index: 2, kind: output, shape index: {}]  }
   0x1   :  { %8 = vsyncpa [#allocation6], 0 }
   0x2   :  { %9 = vsyncpa [#allocation4], 0  ;;  %s14_s11 = sshll.u32 %s226_s0, 4  ;;  %s196_s12 = smov [#allocation2]   ;;  %s15_s11 = int_to_ptr.hbm [resolvable:$true] %s14_s11 }
   0x3   :  { %s16_s13 = sshll.u32 %s196_s12, 4  ;;  %s27_s16 = sshll.u32 %s227_s1, 4  ;;  %s17_s13 = int_to_ptr.vmem [resolvable:$true] %s16_s13  ;;  %s28_s16 = int_to_ptr.hbm [resolvable:$true] %s27_s16 }
   0x4   :  { %s197_s17 = smov 128   ;;  %s198_s18 = smov 8  }
   0x5   :  { %22 = dma.hbm_to_vmem [thread:$0]  %s15_s11, 256, %s17_s13, [#allocation3], %s197_s17, %s197_s17, %s198_s18  }
   0x6   :  { %s199_s19 = smov [#allocation5]  }
   0x7   :  { %s29_s20 = sshll.u32 %s199_s19, 4  ;;  %s30_s20 = int_to_ptr.vmem [resolvable:$true] %s29_s20 }
   0x8   :  { %35 = dma.hbm_to_vmem [thread:$0]  %s28_s16, 256, %s30_s20, [#allocation6], %s197_s17, %s197_s17, %s198_s18  }
   0x9   :  { %190 = dma.done.wait [#allocation3], 256  }
   0xa   :  { %191 = vsyncadd [#allocation3], 4294967040 }
   0xb   :  { %192 = dma.done.wait [#allocation6], 256  }
   0xc   :  { %193 = vsyncadd [#allocation6], 4294967040  ;;  %v200_v0 = vmov 0.0   ;;  %v49_v1 = vld [vmem:[#allocation2] sm:$0xff]  ;;  %v50_v2 = vld [vmem:[#allocation2 + $0x8] sm:$0xff]  ;;  %vm86_vm0 = vcmask 1040384  }
   0xd   :  { %48 = vst [vmem:[#allocation7] sm:$0xf] %v200_v0  ;;  %v51_v3 = vld [vmem:[#allocation5] sm:$0xff]  ;;  %v52_v4 = vld [vmem:[#allocation5 + $0x8] sm:$0xff]  ;;  %v53_v5 = vadd.f32 %v50_v2, %v49_v1  ;;  %v60_v6 = vmul.f32 %v49_v1, %v49_v1  ;;  %v61_v7 = vmul.f32 %v50_v2, %v50_v2  ;;  %vm88_vm1 = vcmask 1041408   ;;  %s201_s0 = smov [#allocation7]  }
   0xe   :  { %v76_v8 = vmul.f32 %v51_v3, %v51_v3  ;;  %v69_v9 = vadd.f32 %v52_v4, %v51_v3  ;;  %v77_v10 = vmul.f32 %v52_v4, %v52_v4  ;;  %vm90_vm2 = vcmask 1042432   ;;  %s99_s1 = sshll.u32 %s201_s0, 4  ;;  %s101_s23 = sshll.u32 %s228_s2, 4  ;;  %s100_s1 = int_to_ptr.vmem [resolvable:$true] %s99_s1  ;;  %s102_s23 = int_to_ptr.hbm [resolvable:$true] %s101_s23 }
   0xf   :  { %v54_v11 = vrot.slane %v53_v5, 4  ;;  %v62_v12 = vadd.f32 %v61_v7, %v60_v6 }
  0x10   :  { %v70_v13 = vrot.slane %v69_v9, 4  ;;  %v78_v14 = vadd.f32 %v77_v10, %v76_v8 }
  0x11   :  { %v55_v15 = vadd.f32 %v54_v11, %v53_v5  ;;  %v63_v16 = vrot.slane %v62_v12, 4 }
  0x12   :  { %v71_v17 = vadd.f32 %v70_v13, %v69_v9  ;;  %v79_v18 = vrot.slane %v78_v14, 4 }
  0x13   :  { %v56_v19 = vrot.slane %v55_v15, 2  ;;  %v64_v20 = vadd.f32 %v63_v16, %v62_v12 }
  0x14   :  { %v72_v21 = vrot.slane %v71_v17, 2  ;;  %v80_v22 = vadd.f32 %v79_v18, %v78_v14  ;;  %v85_v37 = vld [vmem:[#allocation7] sm:$0xf] }
  0x15   :  { %v57_v23 = vadd.f32 %v56_v19, %v55_v15  ;;  %v65_v24 = vrot.slane %v64_v20, 2 }
  0x16   :  { %v73_v25 = vadd.f32 %v72_v21, %v71_v17  ;;  %v81_v26 = vrot.slane %v80_v22, 2 }
  0x17   :  { %v58_v27 = vrot.slane %v57_v23, 1  ;;  %v66_v28 = vadd.f32 %v65_v24, %v64_v20 }
  0x18   :  { %v74_v29 = vrot.slane %v73_v25, 1  ;;  %v82_v30 = vadd.f32 %v81_v26, %v80_v22 }
  0x19   :  { %v59_v31 = vadd.f32 %v58_v27, %v57_v23  ;;  %v67_v32 = vrot.slane %v66_v28, 1 }
  0x1a   :  { %v75_v33 = vadd.f32 %v74_v29, %v73_v25  ;;  %v83_v34 = vrot.slane %v82_v30, 1 }
  0x1b   :  { %v68_v35 = vadd.f32 %v67_v32, %v66_v28 }
  0x1c   :  { %v84_v36 = vadd.f32 %v83_v34, %v82_v30 }
  0x1d   :  { %v87_v38 = vsel %vm86_vm0, %v59_v31, %v68_v35 }
  0x1e   :  { %v89_v39 = vsel %vm88_vm1, %v87_v38, %v75_v33 }
  0x1f   :  { %v91_v40 = vsel %vm90_vm2, %v89_v39, %v84_v36 }
  0x20   :  { %v92_v41 = vadd.f32 %v91_v40, %v85_v37 }
  0x22   :  { %93 = vst [vmem:[#allocation7] sm:$0xf] %v92_v41 }
  0x23   :  { %104 = dma.vmem_to_hbm [thread:$0]  %s100_s1, 64, %s102_s23, [#allocation4]  }
  0x24   :  { %194 = dma.done.wait [#allocation4], 64  }
  0x25   :  { %195 = vsyncadd [#allocation4], 4294967232 }
  0x26   :  { %109 = vsyncpa [#allocation3], 1 }
  0x27   :  { %110 = vsyncpa [#allocation6], 1 }
  0x28   :  { %111 = vsyncpa [#allocation4], 1 }

</bundles_post_ra>
